<compile_context>
chip_gen: v7x
topology: tpu7x:2x2x1
jax: 0.10.0
libtpu: 0.0.40
codegen_flags: <defaults>
</compile_context>

<pallas_src>
import math

import jax
import jax.numpy as jnp
from jax.experimental import pallas as pl
from jax.experimental.pallas import tpu as pltpu

BN_EPS = 1e-5
LANE = 128


def _round_up(x, m):
    return ((x + m - 1) // m) * m


# ---------------------------------------------------------------------------
# Pallas kernel: one MXU matmul (im2row rows x block-Toeplitz band)
#                + folded-BN bias + ReLU
# ---------------------------------------------------------------------------
def _conv3x3_bias_relu_kernel(xs_ref, band_ref, b_ref, o_ref):
    # xs:   [1, TM, K]   bf16 im2row rows for this (row-tile, width-tile)
    # band: [K, Np]      bf16 block-Toeplitz conv weights (BN folded in)
    # b:    [1, Np]      f32 folded bias
    # o:    [1, TM, Np]  output tile (lane-dense, Np % 128 == 0)
    acc = jnp.dot(xs_ref[0], band_ref[...],
                  preferred_element_type=jnp.float32)   # single MXU contraction
    acc = acc + b_ref[...]                              # broadcast [1, Np]
    o_ref[0] = jnp.maximum(acc, 0.0).astype(o_ref.dtype)


def _choose_width_tile(W, C, n_target=512):
    """Width tile Wt: Wt*C <= ~n_target and (when possible) Wt*C % 128 == 0."""
    if W * C <= n_target:
        return W                                  # single width block
    step = LANE // math.gcd(C, LANE)              # smallest Wt with Wt*C % 128 == 0
    wt = (n_target // (step * C)) * step
    if wt == 0:
        wt = step
    return min(wt, W)


# ---------------------------------------------------------------------------
# Wrapper: BN fold, im2row slab, band construction, pallas_call plumbing
# ---------------------------------------------------------------------------
def conv3x3_bn_relu(x_nhwc, w, b, gamma, beta, mean, var,
                    out_dtype=jnp.float32):
    """relu(BN_eval(conv3x3(x) + b)).  x: [B,H,W,C], w: [3,3,Cin,Cout] (HWIO)."""
    B, H, W, C = x_nhwc.shape

    # ---- fold eval-mode BatchNorm into the conv weight / bias (exact) ----
    s = gamma * jax.lax.rsqrt(var + BN_EPS)               # [C]
    w_f = w * s[None, None, None, :]                      # scale per Cout
    b_f = (b - mean) * s + beta                           # [C]

    # ---- tiling choices --------------------------------------------------
    Wt = _choose_width_tile(W, C)                         # width tile
    Wp = _round_up(W, Wt)                                 # padded width
    NW = Wp // Wt                                         # number of width blocks
    Nt = Wt * C                                           # valid out columns / block
    Np = _round_up(Nt, LANE)                              # lane-dense out columns
    K = 3 * (Wt + 2) * C                                  # contraction length

    M = B * H                                             # one row per output row
    TM = 256 if M > 512 else _round_up(M, 8)              # row tile (multiple of 8)
    Mp = _round_up(M, TM)

    # ---- block-Toeplitz band, shared by every width block -----------------
    # band[(ky*(Wt+2)+wi)*C + ci, wo*C + co] = w_f[ky, wi-wo, ci, co]
    wi = jnp.arange(Wt + 2)
    wo = jnp.arange(Wt)
    kx = jnp.arange(3)
    sel = (wi[None, :, None] == wo[None, None, :] + kx[:, None, None])
    sel = sel.astype(jnp.float32)                         # [3(kx), Wt+2, Wt]
    band = jnp.einsum("xio,yxcd->yicod", sel, w_f)        # [3(ky), Wt+2, C, Wt, C]
    band = band.reshape(K, Nt)
    band = jnp.pad(band, ((0, 0), (0, Np - Nt))).astype(jnp.bfloat16)

    bias = jnp.pad(jnp.tile(b_f, Wt), (0, Np - Nt))
    bias = bias.reshape(1, Np).astype(jnp.float32)

    # ---- im2row slab xs[NW, Mp, K] (bf16): 3 tile-aligned vertical taps ---
    # TODO(synk): move this gather into the kernel (manual halo'd DMA from an
    #             ANY-space NHWC input) to cut the extra wrapper HBM pass.
    xpad = jnp.pad(x_nhwc, ((0, 0), (1, 1), (1, 1 + Wp - W), (0, 0)))
    widx = (jnp.arange(NW) * Wt)[:, None] + jnp.arange(Wt + 2)[None, :]
    xwin = xpad[:, :, widx, :]                            # [B, H+2, NW, Wt+2, C]
    xs = jnp.stack([xwin[:, 0:H], xwin[:, 1:H + 1], xwin[:, 2:H + 2]], axis=3)
    xs = jnp.transpose(xs, (2, 0, 1, 3, 4, 5)).reshape(NW, M, K)
    xs = jnp.pad(xs, ((0, 0), (0, Mp - M), (0, 0))).astype(jnp.bfloat16)

    # ---- cost estimate: useful conv FLOPs only, band counted once ---------
    flops = 2 * B * H * W * 9 * C * C
    bytes_accessed = (xs.size * 2 + band.size * 2 + bias.size * 4
                      + NW * Mp * Np * jnp.dtype(out_dtype).itemsize)

    out = pl.pallas_call(
        _conv3x3_bias_relu_kernel,
        out_shape=jax.ShapeDtypeStruct((NW, Mp, Np), out_dtype),
        grid=(Mp // TM, NW),
        in_specs=[
            pl.BlockSpec((1, TM, K), lambda mi, wj: (wj, mi, 0)),
            pl.BlockSpec((K, Np), lambda mi, wj: (0, 0),
                         pipeline_mode=pl.Buffered(1)),   # constant weights: 1 buffer
            pl.BlockSpec((1, Np), lambda mi, wj: (0, 0),
                         pipeline_mode=pl.Buffered(1)),   # constant bias: 1 buffer
        ],
        out_specs=pl.BlockSpec((1, TM, Np), lambda mi, wj: (wj, mi, 0)),
        compiler_params=pltpu.CompilerParams(
            dimension_semantics=("parallel", "parallel"),
            vmem_limit_bytes=48 * 1024 * 1024),
        cost_estimate=pl.CostEstimate(flops=flops, transcendentals=0,
                                      bytes_accessed=bytes_accessed),
    )(xs, band, bias)

    # ---- strip row / lane / width padding and restore [B, H, W, C] --------
    out = out[:, :M, :Nt].reshape(NW, B, H, Wt, C)
    out = jnp.transpose(out, (1, 2, 0, 3, 4)).reshape(B, H, Wp, C)[:, :, :W, :]
    return out


# ---------------------------------------------------------------------------
# Module forward (only the live branch is executed; NCHW in / NCHW out)
# ---------------------------------------------------------------------------
@jax.jit
def global_local_embedding(x_nchw, p):
    # The NonLocal branch and the conv1/bn1 branch of the original forward are
    # dead (their results are immediately overwritten) and are elided.
    # TODO(synk): if the surrounding graph can consume NHWC (and/or bf16),
    #             drop these layout transposes to save two full HBM passes.
    x = jnp.transpose(x_nchw, (0, 2, 3, 1))               # NCHW -> NHWC
    y = conv3x3_bn_relu(x, p["conv2_w"], p["conv2_b"],
                        p["bn2_gamma"], p["bn2_beta"],
                        p["bn2_mean"], p["bn2_var"])
    return jnp.transpose(y, (0, 3, 1, 2))                 # NHWC -> NCHW


# ---------------------------------------------------------------------------
# Pure-JAX f32 reference (independent of the band-weight construction)
# ---------------------------------------------------------------------------
def reference_forward(x_nchw, p):
    w = p["conv2_w"]                                      # [3,3,Cin,Cout] = HWIO
    y = jax.lax.conv_general_dilated(
        x_nchw, w, window_strides=(1, 1), padding=((1, 1), (1, 1)),
        dimension_numbers=("NCHW", "HWIO", "NCHW"))
    y = y + p["conv2_b"][None, :, None, None]
    s = p["bn2_gamma"] * jax.lax.rsqrt(p["bn2_var"] + BN_EPS)
    y = ((y - p["bn2_mean"][None, :, None, None]) * s[None, :, None, None]
         + p["bn2_beta"][None, :, None, None])
    return jnp.maximum(y, 0.0)


# ---------------------------------------------------------------------------
# Deterministic parameters (only conv2 / bn2 feed the output; NonLocal and
# conv1 / bn1 are dead in the original forward and are not materialized)
# ---------------------------------------------------------------------------
def init_params(key, C):
    kw, kb = jax.random.split(key)
    return {
        "conv2_w": 0.1 * jax.random.normal(kw, (3, 3, C, C), jnp.float32),
        "conv2_b": 0.1 * jax.random.normal(kb, (C,), jnp.float32),
        "bn2_gamma": jnp.ones((C,), jnp.float32),
        "bn2_beta": jnp.zeros((C,), jnp.float32),
        "bn2_mean": jnp.zeros((C,), jnp.float32),
        "bn2_var": jnp.ones((C,), jnp.float32),
    }


if __name__ == "__main__":
    key = jax.random.PRNGKey(0)
    k1x, k1p, k2x, k2p = jax.random.split(key, 4)

    # --- test 1: module spec shape (single width block, Np padded to 128) --
    B, C, H, W = 2, 4, 16, 16
    x = jax.random.normal(k1x, (B, C, H, W), jnp.float32)
    params = init_params(k1p, C)
    out = jax.block_until_ready(global_local_embedding(x, params))
    assert out.shape == (B, C, H, W), out.shape
    ref = jax.block_until_ready(reference_forward(x, params))
    err = float(jnp.max(jnp.abs(out - ref)))
    assert err < 5e-2, f"test1 max abs err vs f32 reference: {err}"

    # --- test 2: exercises the width-tiled path (W*C > 512 -> NW > 1) ------
    B2, C2, H2, W2 = 1, 16, 8, 40
    x2 = jax.random.normal(k2x, (B2, C2, H2, W2), jnp.float32)
    params2 = init_params(k2p, C2)
    out2 = jax.block_until_ready(global_local_embedding(x2, params2))
    assert out2.shape == (B2, C2, H2, W2), out2.shape
    ref2 = jax.block_until_ready(reference_forward(x2, params2))
    err2 = float(jnp.max(jnp.abs(out2 - ref2)))
    assert err2 < 5e-2, f"test2 max abs err vs f32 reference: {err2}"

    print("KERNEL_OK")
</pallas_src>

<mosaic_0001>
module attributes {stable_mosaic.version = 11 : i64} {
  func.func @_conv3x3_bias_relu_kernel(%arg0: i32, %arg1: i32, %arg2: memref<1x32x216xbf16, #tpu.memory_space<vmem>>, %arg3: memref<216x128xbf16, #tpu.memory_space<vmem>>, %arg4: memref<1x128xf32, #tpu.memory_space<vmem>>, %arg5: memref<1x32x128xf32, #tpu.memory_space<vmem>>) attributes {dimension_semantics = [#tpu.dimension_semantics<parallel>, #tpu.dimension_semantics<parallel>], iteration_bounds = array<i64: 1, 1>, scalar_prefetch = 0 : i64, scratch_operands = 0 : i64, tpu.core_type = #tpu.core_type<tc>, window_params = [{transform_indices = @transform_0, window_bounds = array<i64: 1, 32, 216>}, {pipeline_mode = #tpu.pipeline_mode<synchronous>, transform_indices = @transform_1, window_bounds = array<i64: 216, 128>}, {pipeline_mode = #tpu.pipeline_mode<synchronous>, transform_indices = @transform_2, window_bounds = array<i64: 1, 128>}, {transform_indices = @transform_3, window_bounds = array<i64: 1, 32, 128>}]} {
    %c0 = arith.constant 0 : index
    %c0_0 = arith.constant 0 : index
    %c0_1 = arith.constant 0 : index
    %0 = vector.load %arg2[%c0, %c0_0, %c0_1] : memref<1x32x216xbf16, #tpu.memory_space<vmem>>, vector<1x32x216xbf16>
    %1 = vector.shape_cast %0 : vector<1x32x216xbf16> to vector<32x216xbf16>
    %c0_2 = arith.constant 0 : index
    %c0_3 = arith.constant 0 : index
    %2 = vector.load %arg3[%c0_2, %c0_3] : memref<216x128xbf16, #tpu.memory_space<vmem>>, vector<216x128xbf16>
    %cst = arith.constant dense<0.000000e+00> : vector<32x128xf32>
    %3 = tpu.matmul %1, %2, %cst {dimension_numbers = #tpu.dot_dimension_numbers<[1], [0], [0], [1], [0, 0, 1, 1], [], []>} : vector<32x216xbf16>, vector<216x128xbf16>, vector<32x128xf32> -> vector<32x128xf32>
    %c0_4 = arith.constant 0 : index
    %c0_5 = arith.constant 0 : index
    %4 = vector.load %arg4[%c0_4, %c0_5] : memref<1x128xf32, #tpu.memory_space<vmem>>, vector<1x128xf32>
    %5 = vector.broadcast %4 : vector<1x128xf32> to vector<32x128xf32>
    %6 = arith.addf %3, %5 : vector<32x128xf32>
    %cst_6 = arith.constant 0.000000e+00 : f32
    %7 = vector.broadcast %cst_6 : f32 to vector<32x128xf32>
    %8 = arith.maximumf %6, %7 : vector<32x128xf32>
    %c0_7 = arith.constant 0 : index
    %c0_8 = arith.constant 0 : index
    %c0_9 = arith.constant 0 : index
    %9 = vector.load %arg5[%c0_7, %c0_8, %c0_9] : memref<1x32x128xf32, #tpu.memory_space<vmem>>, vector<1x32x128xf32>
    %10 = vector.shape_cast %9 : vector<1x32x128xf32> to vector<32x128xf32>
    %11 = vector.shape_cast %8 : vector<32x128xf32> to vector<1x32x128xf32>
    tpu.vector_store %arg5[%c0_7, %c0_8, %c0_9], %11 {strides = array<i32>} : memref<1x32x128xf32, #tpu.memory_space<vmem>>, vector<1x32x128xf32>,
    return
  }
  func.func @transform_0(%arg0: i32, %arg1: i32) -> (i32, i32, i32) {
    %c0_i32 = arith.constant 0 : i32
    %c0_i32_0 = arith.constant 0 : i32
    return %arg1, %arg0, %c0_i32 : i32, i32, i32
  }
  func.func @transform_1(%arg0: i32, %arg1: i32) -> (i32, i32) {
    %c0_i32 = arith.constant 0 : i32
    %c0_i32_0 = arith.constant 0 : i32
    %c0_i32_1 = arith.constant 0 : i32
    return %c0_i32, %c0_i32_0 : i32, i32
  }
  func.func @transform_2(%arg0: i32, %arg1: i32) -> (i32, i32) {
    %c0_i32 = arith.constant 0 : i32
    %c0_i32_0 = arith.constant 0 : i32
    %c0_i32_1 = arith.constant 0 : i32
    return %c0_i32, %c0_i32_0 : i32, i32
  }
  func.func @transform_3(%arg0: i32, %arg1: i32) -> (i32, i32, i32) {
    %c0_i32 = arith.constant 0 : i32
    %c0_i32_0 = arith.constant 0 : i32
    return %arg1, %arg0, %c0_i32 : i32, i32, i32
  }
}

</mosaic_0001>

<bundles_post_ra>
// kernel: tile.8
= control target key start
LH: loop header
LB: loop body
LE: loop exit
PB: predicated region body
PF: predicated region fallthrough
CT: control target
= control target key end

     0   :  { %s28_s0 = inlined_call_operand.vmem [shape: f32[4], index: 0, kind: input, shape index: {}]   ;;  %s29_s1 = inlined_call_operand.vmem [shape: f32[16,4], index: 1, kind: output, shape index: {}]  }
   0x1   :  { %v4_v0 = vld [vmem:[%s28_s0] ss:$0 sm:$0xff] }
   0x2   :  { %5 = vst [vmem:[%s29_s1] sm:$0xff] %v4_v0  ;;  %8 = vst [vmem:[%s29_s1 + $0x8] sm:$0xff] %v4_v0 }

// kernel: tile.9
= control target key start
LH: loop header
LB: loop body
LE: loop exit
PB: predicated region body
PF: predicated region fallthrough
CT: control target
= control target key end

     0   :  { %s131_s10 = smov 60   ;;  %s132_s11 = smov 52   ;;  %vm3_vm0 = vcmask 31744   ;;  %vm9_vm1 = vcmask 523744   ;;  %vm15_vm2 = vcmask 490944   ;;  %vm21_vm3 = vcmask 458144   ;;  %s207_s0 = inlined_call_operand.vmem [shape: f32[16,4], index: 0, kind: input, shape index: {}]   ;;  %s208_s1 = inlined_call_operand.vmem [shape: f32[64], index: 1, kind: output, shape index: {}]  }
   0x1   :  { %v101_v0 = vld [vmem:[%s207_s0 + $0xf] sm:$0x1]   ;;  %v103_v1 = vld [vmem:[%s207_s0 + $0xd] sm:$0x1]   ;;  %v102_v2 = vld [vmem:[%s207_s0 + $0xe] sm:$0x1]  }
   0x2   :  { %7 = vrot.lane.b32.xlu0 %v101_v0, %s131_s10  ;;  %19 = vrot.lane.b32.xlu1 %v103_v1, %s132_s11  ;;  %v104_v3 = vld [vmem:[%s207_s0 + $0xc] sm:$0x1]   ;;  %s133_s16 = smov 56   ;;  %s134_s17 = smov 48   ;;  %v105_v4 = vld [vmem:[%s207_s0 + $0xb] sm:$0x1]  }
   0x3   :  { %v106_v5 = vld [vmem:[%s207_s0 + $0xa] sm:$0x1]   ;;  %v2_v6 = vld [vmem:[%s207_s0] sm:$0x1]   ;;  %s135_s24 = smov 44   ;;  %s136_s25 = smov 40  }
   0x4   :  { %4 = vst.msk [vmem:[#allocation0] sm:$0x1] %vm3_vm0, %v2_v6   ;;  %v107_v7 = vld [vmem:[%s207_s0 + $0x9] sm:$0x1]   ;;  %v108_v8 = vld [vmem:[%s207_s0 + $0x8] sm:$0x1]  }
   0x5   :  { %s137_s30 = smov 36   ;;  %s138_s2 = smov 32   ;;  %v109_v9 = vld [vmem:[%s207_s0 + $0x7] sm:$0x1]   ;;  %v110_v10 = vld [vmem:[%s207_s0 + $0x6] sm:$0x1]  }
   0x6   :  { %13 = vrot.lane.b32.xlu0 %v102_v2, %s133_s16  ;;  %25 = vrot.lane.b32.xlu1 %v104_v3, %s134_s17  ;;  %s139_s7 = smov 28   ;;  %s140_s8 = smov 24   ;;  %v111_v11 = vld [vmem:[%s207_s0 + $0x5] sm:$0x1]   ;;  %v112_v12 = vld [vmem:[%s207_s0 + $0x4] sm:$0x1]  }
   0x7   :  { %s141_s13 = smov 20   ;;  %s142_s14 = smov 16   ;;  %v113_v13 = vld [vmem:[%s207_s0 + $0x3] sm:$0x1]   ;;  %v114_v14 = vld [vmem:[%s207_s0 + $0x2] sm:$0x1]  }
   0x8   :  { %s143_s19 = smov 12   ;;  %s144_s20 = smov 8   ;;  %v115_v15 = vld [vmem:[%s207_s0 + $0x1] sm:$0x1]   ;;  %vm27_vm4 = vcmask 425344   ;;  %vm33_vm5 = vcmask 392544  }
   0x9   :  { %s145_s0 = smov 4   ;;  %vm39_vm6 = vcmask 359744   ;;  %vm45_vm7 = vcmask 326944   ;;  %vm51_vm8 = vcmask 294144   ;;  %vm57_vm9 = vcmask 261344  }
   0xa   :  { %31 = vrot.lane.b32.xlu0 %v105_v4, %s135_s24  ;;  %37 = vrot.lane.b32.xlu1 %v106_v5, %s136_s25  ;;  %vm63_vm10 = vcmask 228544   ;;  %vm69_vm11 = vcmask 195744   ;;  %vm75_vm12 = vcmask 162944   ;;  %vm81_vm13 = vcmask 130144  }
   0xb   :  { %vm87_vm14 = vcmask 97344   ;;  %vm93_vm15 = vcmask 64544  }
   0xe   :  { %43 = vrot.lane.b32.xlu0 %v107_v7, %s137_s30  ;;  %49 = vrot.lane.b32.xlu1 %v108_v8, %s138_s2 }
  0x12   :  { %55 = vrot.lane.b32.xlu0 %v109_v9, %s139_s7  ;;  %61 = vrot.lane.b32.xlu1 %v110_v10, %s140_s8 }
  0x16   :  { %67 = vrot.lane.b32.xlu0 %v111_v11, %s141_s13  ;;  %73 = vrot.lane.b32.xlu1 %v112_v12, %s142_s14 }
  0x1a   :  { %79 = vrot.lane.b32.xlu0 %v113_v13, %s143_s19  ;;  %85 = vrot.lane.b32.xlu1 %v114_v14, %s144_s20 }
  0x1e   :  { %91 = vrot.lane.b32.xlu0 %v115_v15, %s145_s0 }
  0x74   :  { %v8_v16 = vpop.permute.xlu0 %7   ;;  %v20_v17 = vpop.permute.xlu1 %19  }
  0x75   :  { %10 = vst.msk [vmem:[#allocation0] sm:$0x1] %vm9_vm1, %v8_v16  }
  0x78   :  { %v14_v18 = vpop.permute.xlu0 %13   ;;  %v26_v19 = vpop.permute.xlu1 %25  }
  0x79   :  { %16 = vst.msk [vmem:[#allocation0] sm:$0x1] %vm15_vm2, %v14_v18  }
  0x7a   :  { %22 = vst.msk [vmem:[#allocation0] sm:$0x1] %vm21_vm3, %v20_v17  }
  0x7b   :  { %28 = vst.msk [vmem:[#allocation0] sm:$0x1] %vm27_vm4, %v26_v19  }
  0x7c   :  { %v32_v20 = vpop.permute.xlu0 %31   ;;  %v38_v21 = vpop.permute.xlu1 %37  }
  0x7d   :  { %34 = vst.msk [vmem:[#allocation0] sm:$0x1] %vm33_vm5, %v32_v20  }
  0x7e   :  { %40 = vst.msk [vmem:[#allocation0] sm:$0x1] %vm39_vm6, %v38_v21  }
  0x80   :  { %v44_v22 = vpop.permute.xlu0 %43   ;;  %v50_v23 = vpop.permute.xlu1 %49  }
  0x81   :  { %46 = vst.msk [vmem:[#allocation0] sm:$0x1] %vm45_vm7, %v44_v22  }
  0x82   :  { %52 = vst.msk [vmem:[#allocation0] sm:$0x1] %vm51_vm8, %v50_v23  }
  0x84   :  { %v56_v24 = vpop.permute.xlu0 %55   ;;  %v62_v25 = vpop.permute.xlu1 %61  }
  0x85   :  { %58 = vst.msk [vmem:[#allocation0] sm:$0x1] %vm57_vm9, %v56_v24  }
  0x86   :  { %64 = vst.msk [vmem:[#allocation0] sm:$0x1] %vm63_vm10, %v62_v25  }
  0x88   :  { %v68_v26 = vpop.permute.xlu0 %67   ;;  %v74_v27 = vpop.permute.xlu1 %73  }
  0x89   :  { %70 = vst.msk [vmem:[#allocation0] sm:$0x1] %vm69_vm11, %v68_v26  }
  0x8a   :  { %76 = vst.msk [vmem:[#allocation0] sm:$0x1] %vm75_vm12, %v74_v27  }
  0x8c   :  { %v80_v28 = vpop.permute.xlu0 %79   ;;  %v86_v29 = vpop.permute.xlu1 %85  }
  0x8d   :  { %82 = vst.msk [vmem:[#allocation0] sm:$0x1] %vm81_vm13, %v80_v28  }
  0x8e   :  { %88 = vst.msk [vmem:[#allocation0] sm:$0x1] %vm87_vm14, %v86_v29  }
  0x90   :  { %v92_v30 = vpop.permute.xlu0 %91  }
  0x91   :  { %94 = vst.msk [vmem:[#allocation0] sm:$0x1] %vm93_vm15, %v92_v30  }
  0x98   :  { %v98_v31 = vld [vmem:[#allocation0] sm:$0x1] }
  0x99   :  { %100 = vst [vmem:[%s208_s1] sm:$0x1] %v98_v31 }

// kernel: global_local_embedding.1
= control target key start
LH: loop header
LB: loop body
LE: loop exit
PB: predicated region body
PF: predicated region fallthrough
CT: control target
= control target key end

     0   :  { %v294_v0 = vmov 0   ;;  %vm152_vm0 = vcmask 719872   ;;  %vm159_vm1 = vcmask 1043456   ;;  %s412_s1 = inlined_call_operand.vmem [shape: bf16[216,128], index: 1, kind: input, shape index: {}]   ;;  %s413_s0 = inlined_call_operand.vmem [shape: bf16[1,32,216], index: 0, kind: input, shape index: {}]   ;;  %s414_s2 = inlined_call_operand.vmem [shape: f32[1,128], index: 2, kind: input, shape index: {}]   ;;  %s415_s3 = inlined_call_operand.vmem [shape: f32[1,32,128], index: 3, kind: output, shape index: {}]  }
   0x1   :  { %163 = vmatprep.subr.bf16.mxu0 %v294_v0  ;;  %245 = vmatprep.subr.bf16.mxu1 %v294_v0  ;;  %v274_v1 = vld [vmem:[%s412_s1] sm:$0xff]   ;;  %v275_v2 = vld [vmem:[%s412_s1 + $0x8] sm:$0xff]   ;;  %v276_v3 = vld [vmem:[%s412_s1 + $0x10] sm:$0xff]  }
   0x2   :  { %164 = vmatpush1.bf16.msra.mxu0 %v274_v1  ;;  %259 = vmatpush1.bf16.msra.mxu1 %v274_v1  ;;  %v277_v4 = vld [vmem:[%s412_s1 + $0x18] sm:$0xff]   ;;  %v278_v5 = vld [vmem:[%s412_s1 + $0x20] sm:$0xff]   ;;  %v279_v8 = vld [vmem:[%s412_s1 + $0x28] sm:$0xff]  }
   0x3   :  { %165 = vmatprep.subr.bf16.mxu0 %v294_v0  ;;  %246 = vmatprep.subr.bf16.mxu1 %v294_v0  ;;  %v290_v6 = vld [vmem:[%s413_s0 + $0x4] ss:$8 sps:$4 sm:$0xff]   ;;  %v293_v7 = vld [vmem:[%s413_s0 + $0x14] ss:$8 sps:$4 sm:$0xff]   ;;  %v287_v16 = vld [vmem:[%s412_s1 + $0x68] ss:$0 sps:$4 sm:$0xff]  }
   0x4   :  { %243 = vmatprep.mubr.msk.bf16.mxu0 %vm152_vm0, %v290_v6  ;;  %244 = vmatprep.mubr.msk.bf16.mxu1 %vm152_vm0, %v293_v7  ;;  %v280_v9 = vld [vmem:[%s412_s1 + $0x30] sm:$0xff]   ;;  %v281_v10 = vld [vmem:[%s412_s1 + $0x38] sm:$0xff]   ;;  %v282_v11 = vld [vmem:[%s412_s1 + $0x40] sm:$0xff]   ;;  %v161_v17 = vsel %vm159_vm1, %v287_v16, 0 }
   0x5   :  { %v283_v12 = vld [vmem:[%s412_s1 + $0x48] sm:$0xff]   ;;  %v284_v13 = vld [vmem:[%s412_s1 + $0x50] sm:$0xff]   ;;  %v285_v14 = vld [vmem:[%s412_s1 + $0x58] sm:$0xff]  }
   0x6   :  { %166 = vmatpush1.bf16.msra.mxu0 %v275_v2  ;;  %260 = vmatpush1.bf16.msra.mxu1 %v275_v2  ;;  %v286_v15 = vld [vmem:[%s412_s1 + $0x60] sm:$0xff]   ;;  %v291_v19 = vld [vmem:[%s413_s0 + $0x10] ss:$8 sps:$4 sm:$0xff]  }
   0x7   :  { %167 = vmatprep.subr.bf16.mxu0 %v294_v0  ;;  %247 = vmatprep.subr.bf16.mxu1 %v294_v0  ;;  %v288_v18 = vld [vmem:[%s413_s0] ss:$8 sps:$4 sm:$0xff]  }
   0x8   :  { %v224_v20 = vld [vmem:[%s414_s2] ss:$0 sm:$0xff] }
   0xa   :  { %168 = vmatpush1.bf16.msra.mxu0 %v276_v3  ;;  %261 = vmatpush1.bf16.msra.mxu1 %v276_v3 }
   0xb   :  { %169 = vmatprep.subr.bf16.mxu0 %v294_v0  ;;  %248 = vmatprep.subr.bf16.mxu1 %v294_v0 }
   0xe   :  { %170 = vmatpush1.bf16.msra.mxu0 %v277_v4  ;;  %262 = vmatpush1.bf16.msra.mxu1 %v277_v4 }
   0xf   :  { %171 = vmatprep.subr.bf16.mxu0 %v294_v0  ;;  %249 = vmatprep.subr.bf16.mxu1 %v294_v0 }
  0x12   :  { %172 = vmatpush1.bf16.msra.mxu0 %v278_v5  ;;  %263 = vmatpush1.bf16.msra.mxu1 %v278_v5 }
  0x13   :  { %173 = vmatprep.subr.bf16.mxu0 %v294_v0  ;;  %250 = vmatprep.subr.bf16.mxu1 %v294_v0 }
  0x16   :  { %174 = vmatpush1.bf16.msra.mxu0 %v279_v8  ;;  %264 = vmatpush1.bf16.msra.mxu1 %v279_v8 }
  0x17   :  { %175 = vmatprep.subr.bf16.mxu0 %v294_v0  ;;  %251 = vmatprep.subr.bf16.mxu1 %v294_v0 }
  0x1a   :  { %176 = vmatpush1.bf16.msra.mxu0 %v280_v9  ;;  %265 = vmatpush1.bf16.msra.mxu1 %v280_v9 }
  0x1b   :  { %177 = vmatprep.subr.bf16.mxu0 %v294_v0  ;;  %252 = vmatprep.subr.bf16.mxu1 %v294_v0 }
  0x1e   :  { %178 = vmatpush1.bf16.msra.mxu0 %v281_v10  ;;  %266 = vmatpush1.bf16.msra.mxu1 %v281_v10 }
  0x1f   :  { %179 = vmatprep.subr.bf16.mxu0 %v294_v0  ;;  %253 = vmatprep.subr.bf16.mxu1 %v294_v0 }
  0x22   :  { %180 = vmatpush1.bf16.msra.mxu0 %v282_v11  ;;  %267 = vmatpush1.bf16.msra.mxu1 %v282_v11 }
  0x23   :  { %181 = vmatprep.subr.bf16.mxu0 %v294_v0  ;;  %254 = vmatprep.subr.bf16.mxu1 %v294_v0 }
  0x26   :  { %182 = vmatpush1.bf16.msra.mxu0 %v283_v12  ;;  %268 = vmatpush1.bf16.msra.mxu1 %v283_v12 }
  0x27   :  { %183 = vmatprep.subr.bf16.mxu0 %v294_v0  ;;  %255 = vmatprep.subr.bf16.mxu1 %v294_v0 }
  0x2a   :  { %184 = vmatpush1.bf16.msra.mxu0 %v284_v13  ;;  %269 = vmatpush1.bf16.msra.mxu1 %v284_v13 }
  0x2b   :  { %185 = vmatprep.subr.bf16.mxu0 %v294_v0  ;;  %256 = vmatprep.subr.bf16.mxu1 %v294_v0 }
  0x2e   :  { %186 = vmatpush1.bf16.msra.mxu0 %v285_v14  ;;  %270 = vmatpush1.bf16.msra.mxu1 %v285_v14 }
  0x2f   :  { %187 = vmatprep.subr.bf16.mxu0 %v294_v0  ;;  %257 = vmatprep.subr.bf16.mxu1 %v294_v0 }
  0x32   :  { %188 = vmatpush1.bf16.msra.mxu0 %v286_v15  ;;  %271 = vmatpush1.bf16.msra.mxu1 %v286_v15 }
  0x33   :  { %189 = vmatprep.subr.bf16.mxu0 %v294_v0  ;;  %258 = vmatprep.subr.bf16.mxu1 %v294_v0 }
  0x36   :  { %190 = vmatpush1.bf16.msra.mxu0 %v161_v17  ;;  %272 = vmatpush1.bf16.msra.mxu1 %v161_v17 }
  0x39   :  { %196 = vmatmul.mubr.bf16.vlgmr.msra.gmra.mrb[0].mxu0 %v288_v18  ;;  %204 = vmatmul.mubr.bf16.vlgmr.msra.gmra.mrb[0].mxu1 %v291_v19 }
 0x10c   :  { %v197_v21 = vpop.f32.mrb[0].mxu0  ;;  %v205_v22 = vpop.f32.mrb[0].mxu1 }
 0x10d   :  { %v198_v23 = vadd.f32 %v224_v20, %v197_v21  ;;  %v206_v24 = vadd.f32 %v224_v20, %v205_v22  ;;  %v199_v25 = vpop.f32.mrb[1].mxu0  ;;  %v207_v26 = vpop.f32.mrb[1].mxu1 }
 0x10e   :  { %v200_v27 = vpop.f32.mrb[2].mxu0  ;;  %v208_v28 = vpop.f32.mrb[2].mxu1 }
 0x10f   :  { %v212_v29 = vmax.f32 %v198_v23, 0.0  ;;  %v214_v30 = vmax.f32 %v206_v24, 0.0  ;;  %v201_v31 = vadd.f32 %v224_v20, %v200_v27  ;;  %v209_v32 = vadd.f32 %v224_v20, %v208_v28  ;;  %v202_v33 = vpop.f32.mrb[3].mxu0  ;;  %v210_v34 = vpop.f32.mrb[3].mxu1 }
 0x111   :  { %216 = vst [vmem:[%s415_s3] sm:$0xff] %v212_v29  ;;  %218 = vst [vmem:[%s415_s3 + $0x10] sm:$0xff] %v214_v30  ;;  %v213_v35 = vmax.f32 %v201_v31, 0.0  ;;  %v215_v36 = vmax.f32 %v209_v32, 0.0 }
 0x113   :  { %217 = vst [vmem:[%s415_s3 + $0x8] sm:$0xff] %v213_v35  ;;  %219 = vst [vmem:[%s415_s3 + $0x18] sm:$0xff] %v215_v36 }

</bundles_post_ra>
